<compile_context>
chip_gen: v7x
topology: tpu7x:2x2x1
jax: 0.10.0
libtpu: 0.0.40
codegen_flags: <defaults>
</compile_context>

<pallas_src>
import functools

import jax
import jax.numpy as jnp
from jax import lax
from jax.experimental import pallas as pl
from jax.experimental.pallas import tpu as pltpu


def _focal_loss_kernel(logits_ref, targets_ref, out_ref, *,
                       gamma, n_rows, block_rows, ragged):
    # logits_ref: (TM, C) | targets_ref: (TM, 1) int32 | out_ref: (1, 1) f32 SMEM block
    i = pl.program_id(0)

    x = logits_ref[...].astype(jnp.float32)                   # (TM, C)
    t = targets_ref[...]                                      # (TM, 1) int32
    tm, c = x.shape

    # numerically-stable log-softmax pieces (single exp over the tile)
    m = jnp.max(x, axis=-1, keepdims=True)                    # (TM, 1)
    z = x - m                                                  # (TM, C)
    ez = jnp.exp(z)                                            # (TM, C)
    sum_ez = jnp.sum(ez, axis=-1, keepdims=True)               # (TM, 1)

    # gather the target logit with a lane mask + reduce (no float one-hot tile)
    col = lax.broadcasted_iota(jnp.int32, (tm, c), 1)
    z_t = jnp.sum(jnp.where(col == t, z, 0.0), axis=-1, keepdims=True)   # (TM, 1)

    ce = jnp.log(sum_ez) - z_t                                 # per-sample cross-entropy
    pt = jnp.exp(-ce)                                          # (TM,1) exp; exact, no gather

    g = float(gamma)
    if g == int(g) and g >= 0:
        focal = lax.integer_pow(1.0 - pt, int(g)) * ce         # VPU squaring, NaN-safe
    else:
        focal = jnp.maximum(1.0 - pt, 0.0) ** g * ce           # clamp base for float gamma

    if not ragged:
        out_ref[0, 0] = jnp.sum(focal)                         # per-tile partial sum
    else:
        last = pl.num_programs(0) - 1

        @pl.when(i != last)
        def _full():
            out_ref[0, 0] = jnp.sum(focal)

        @pl.when(i == last)
        def _tail():
            # mask rows of the ragged final tile that fall past the true N
            row = lax.broadcasted_iota(jnp.int32, (tm, 1), 0) + i * block_rows
            out_ref[0, 0] = jnp.sum(jnp.where(row < n_rows, focal, 0.0))


def focal_loss(logits, targets, *, gamma=2.0, block_rows=None,
               vmem_budget_bytes=None):
    """FocalLoss(alpha=None, gamma=gamma, reduction='mean') forward pass.

    `logits` may be f32 or bf16 in HBM (the cast to f32 happens inside the kernel,
    so bf16 storage halves the DMA'd bytes of this bandwidth-bound kernel).
    alpha (per-class weights) is not supported — matches the alpha=None config.
    """
    n, c = logits.shape
    t2d = targets.astype(jnp.int32).reshape(n, 1)

    # Lane-padded per-row footprints: a (TM, C<128) tile still occupies ceil(C/128)*128
    # lanes in VMEM and in every full-tile temporary.
    lanes = ((c + 127) // 128) * 128
    in_row = lanes * logits.dtype.itemsize
    f32_row = lanes * 4

    if block_rows is None:
        # Budget: double-buffered input tile + ~4 full-tile f32 temporaries, kept well
        # under v7x's 64 MiB per-TC VMEM (and trivially fine for v5e/v6e's 128 MiB).
        budget = 36 * 1024 * 1024 if vmem_budget_bytes is None else int(vmem_budget_bytes)
        per_row = 2 * in_row + 4 * f32_row
        block_rows = max(8, (budget // per_row) // 8 * 8)

    if block_rows >= n:
        tm = n                          # single full-extent block (always legal)
        grid = (1,)
    else:
        tm = max((block_rows // 8) * 8, 8)   # multiple of 8 -> (8,128) tiling rule
        grid = (pl.cdiv(n, tm),)

    num_tiles = grid[0]
    ragged = (n % tm) != 0

    # Explicit VMEM limit: double-buffered input + ~5 full-tile f32 temps + slack,
    # capped below v7x's 64 MiB physical per-TC VMEM.
    vmem_needed = 2 * tm * in_row + 5 * tm * f32_row + (1 << 20)
    vmem_limit = int(min(max(vmem_needed, 16 * 1024 * 1024), 60 * 1024 * 1024))

    kernel = functools.partial(_focal_loss_kernel, gamma=gamma, n_rows=n,
                               block_rows=tm, ragged=ragged)

    partials = pl.pallas_call(
        kernel,
        out_shape=jax.ShapeDtypeStruct((num_tiles, 1), jnp.float32),
        grid_spec=pltpu.PrefetchScalarGridSpec(
            num_scalar_prefetch=0,
            grid=grid,
            in_specs=[
                pl.BlockSpec((tm, c), lambda i: (i, 0)),      # logits tile
                pl.BlockSpec((tm, 1), lambda i: (i, 0)),      # targets tile
            ],
            # one scalar partial per grid step; independent blocks -> axis is parallel,
            # so megacore can split the row loop across both TCs on v7x.
            out_specs=pl.BlockSpec((1, 1), lambda i: (i, 0),
                                   memory_space=pltpu.MemorySpace.SMEM),
        ),
        compiler_params=pltpu.CompilerParams(
            dimension_semantics=("parallel",),
            vmem_limit_bytes=vmem_limit),
    )(logits, t2d)

    # reduction='mean' over the true N (tree-reduce of per-tile partials in the wrapper
    # keeps f32 accumulation error bounded for very large N).
    return jnp.sum(partials) / jnp.float32(n)


def _focal_loss_ref(logits, targets, *, gamma=2.0):
    logp = jax.nn.log_softmax(logits.astype(jnp.float32), axis=-1)
    ce = -jnp.take_along_axis(logp, targets.astype(jnp.int32)[:, None], axis=-1)[:, 0]
    pt = jnp.exp(-ce)
    return jnp.mean((1.0 - pt) ** gamma * ce)


if __name__ == "__main__":
    # alpha=None (no class weights), gamma=2, reduction='mean' — no learnable params.
    key = jax.random.PRNGKey(0)
    k_x, k_t = jax.random.split(key)

    N, C = 200, 32
    logits = jax.random.normal(k_x, (N, C), dtype=jnp.float32)
    targets = jax.random.randint(k_t, (N,), 0, C, dtype=jnp.int32)

    ref = _focal_loss_ref(logits, targets, gamma=2.0)

    # default block sizing: budget >> N rows -> single full-extent tile, one grid step
    loss = jax.block_until_ready(focal_loss(logits, targets, gamma=2.0))
    assert jnp.allclose(loss, ref, rtol=1e-4, atol=1e-5), (loss, ref)

    # forced 64-row tile: 4 grid steps with a ragged final block -> exercises the
    # per-tile partial-sum outputs, the "parallel" grid axis and the masked tail.
    loss_tiled = jax.block_until_ready(
        focal_loss(logits, targets, gamma=2.0, block_rows=64))
    assert jnp.allclose(loss_tiled, ref, rtol=1e-4, atol=1e-5), (loss_tiled, ref)

    print("KERNEL_OK")
</pallas_src>

<mosaic_0001>
module attributes {stable_mosaic.version = 11 : i64} {
  func.func @_focal_loss_kernel(%arg0: i32, %arg1: memref<200x32xf32, #tpu.memory_space<vmem>>, %arg2: memref<200x1xi32, #tpu.memory_space<vmem>>, %arg3: memref<1x1xf32, #tpu.memory_space<smem>>) attributes {dimension_semantics = [#tpu.dimension_semantics<parallel>], iteration_bounds = array<i64: 1>, scalar_prefetch = 0 : i64, scratch_operands = 0 : i64, tpu.core_type = #tpu.core_type<tc>, window_params = [{transform_indices = @transform_0, window_bounds = array<i64: 200, 32>}, {transform_indices = @transform_1, window_bounds = array<i64: 200, 1>}, {transform_indices = @transform_2, window_bounds = array<i64: 1, 1>}]} {
    %c0 = arith.constant 0 : index
    %c0_0 = arith.constant 0 : index
    %0 = vector.load %arg1[%c0, %c0_0] : memref<200x32xf32, #tpu.memory_space<vmem>>, vector<200x32xf32>
    %c0_1 = arith.constant 0 : index
    %c0_2 = arith.constant 0 : index
    %1 = vector.load %arg2[%c0_1, %c0_2] : memref<200x1xi32, #tpu.memory_space<vmem>>, vector<200x1xi32>
    %cst = arith.constant dense<0xFF800000> : vector<200xf32>
    %2 = vector.multi_reduction <maximumf>, %0, %cst [1] : vector<200x32xf32> to vector<200xf32>
    %3 = vector.shape_cast %2 : vector<200xf32> to vector<200x1xf32>
    %4 = vector.broadcast %3 : vector<200x1xf32> to vector<200x32xf32>
    %5 = arith.subf %0, %4 : vector<200x32xf32>
    %6 = math.exp %5 : vector<200x32xf32>
    %cst_3 = arith.constant dense<0.000000e+00> : vector<200xf32>
    %7 = vector.multi_reduction <add>, %6, %cst_3 [1] : vector<200x32xf32> to vector<200xf32>
    %8 = vector.shape_cast %7 : vector<200xf32> to vector<200x1xf32>
    %9 = tpu.iota {dimensions = array<i32: 1>} : vector<200x32xi32>
    %10 = vector.broadcast %1 : vector<200x1xi32> to vector<200x32xi32>
    %11 = arith.cmpi eq, %9, %10 : vector<200x32xi32>
    %cst_4 = arith.constant 0.000000e+00 : f32
    %12 = vector.broadcast %cst_4 : f32 to vector<200x32xf32>
    %13 = arith.select %11, %5, %12 : vector<200x32xi1>, vector<200x32xf32>
    %cst_5 = arith.constant dense<0.000000e+00> : vector<200xf32>
    %14 = vector.multi_reduction <add>, %13, %cst_5 [1] : vector<200x32xf32> to vector<200xf32>
    %15 = vector.shape_cast %14 : vector<200xf32> to vector<200x1xf32>
    %16 = math.log %8 : vector<200x1xf32>
    %17 = arith.subf %16, %15 : vector<200x1xf32>
    %cst_6 = arith.constant 0.000000e+00 : f32
    %18 = vector.broadcast %cst_6 : f32 to vector<200x1xf32>
    %19 = arith.subf %18, %17 : vector<200x1xf32>
    %20 = math.exp %19 : vector<200x1xf32>
    %cst_7 = arith.constant 1.000000e+00 : f32
    %21 = vector.broadcast %cst_7 : f32 to vector<200x1xf32>
    %22 = arith.subf %21, %20 : vector<200x1xf32>
    %23 = arith.mulf %22, %22 : vector<200x1xf32>
    %24 = arith.mulf %23, %17 : vector<200x1xf32>
    %25 = vector.shape_cast %24 : vector<200x1xf32> to vector<1x200x1xf32>
    %cst_8 = arith.constant dense<0.000000e+00> : vector<1xf32>
    %26 = vector.multi_reduction <add>, %25, %cst_8 [1, 2] : vector<1x200x1xf32> to vector<1xf32>
    %27 = vector.shape_cast %26 : vector<1xf32> to vector<1x1x1xf32>
    %28 = vector.extract %27[0, 0, 0] : f32 from vector<1x1x1xf32>
    %c0_9 = arith.constant 0 : index
    %c0_10 = arith.constant 0 : index
    %29 = memref.load %arg3[%c0_9, %c0_10] : memref<1x1xf32, #tpu.memory_space<smem>>
    memref.store %28, %arg3[%c0_9, %c0_10] : memref<1x1xf32, #tpu.memory_space<smem>>
    return
  }
  func.func @transform_0(%arg0: i32) -> (i32, i32) {
    %c0_i32 = arith.constant 0 : i32
    %c0_i32_0 = arith.constant 0 : i32
    return %arg0, %c0_i32 : i32, i32
  }
  func.func @transform_1(%arg0: i32) -> (i32, i32) {
    %c0_i32 = arith.constant 0 : i32
    %c0_i32_0 = arith.constant 0 : i32
    return %arg0, %c0_i32 : i32, i32
  }
  func.func @transform_2(%arg0: i32) -> (i32, i32) {
    %c0_i32 = arith.constant 0 : i32
    %c0_i32_0 = arith.constant 0 : i32
    return %arg0, %c0_i32 : i32, i32
  }
}

</mosaic_0001>

<bundles_post_ra>
// kernel: tpu_custom_call.1
= control target key start
LH: loop header
LB: loop body
LE: loop exit
PB: predicated region body
PF: predicated region fallthrough
CT: control target
= control target key end

     0   :  { %vm62_vm0 = vcmask 261120   ;;  %v957_v6 = vmov 0   ;;  %s1585_s0 = inlined_call_operand.vmem [shape: f32[200,32], index: 0, kind: input, shape index: {}]   ;;  %s1586_s1 = inlined_call_operand.vmem [shape: s32[200,1], index: 1, kind: input, shape index: {}]   ;;  %s1587_s2 = inlined_call_operand.hbm [shape: f32[1,1], index: 2, kind: output, shape index: {}]  }
   0x1   :  { %v977_v0 = vld [vmem:[%s1585_s0 + $0x10] sm:$0xff]  ;;  %v982_v1 = vld [vmem:[%s1585_s0] sm:$0xff]  ;;  %v987_v2 = vld [vmem:[%s1585_s0 + $0x18] sm:$0xff]  ;;  %794 = vset.pattern.permute.xlu1 %v957_v6  ;;  %793 = vset.pattern.permute.xlu0 %v957_v6 }
   0x2   :  { %v69_v3 = vsel %vm62_vm0, %v977_v0, -inf  ;;  %v63_v4 = vsel %vm62_vm0, %v982_v1, -inf  ;;  %v996_v5 = vld [vmem:[%s1585_s0 + $0x8] sm:$0xff]  ;;  %v72_v7 = vsel %vm62_vm0, %v987_v2, -inf  ;;  %v1010_v10 = vld [vmem:[%s1585_s0 + $0x20] sm:$0xff]  ;;  %v1019_v13 = vld [vmem:[%s1585_s0 + $0x38] sm:$0xff] }
   0x3   :  { %70 = vmax.xlane.f32.xlu1 %v69_v3  ;;  %64 = vmax.xlane.f32.xlu0 %v63_v4  ;;  %v66_v8 = vsel %vm62_vm0, %v996_v5, -inf  ;;  %v1005_v9 = vld [vmem:[%s1585_s0 + $0x28] sm:$0xff]  ;;  %v75_v12 = vsel %vm62_vm0, %v1010_v10, -inf  ;;  %v1024_v14 = vld [vmem:[%s1585_s0 + $0x30] sm:$0xff]  ;;  %v84_v15 = vsel %vm62_vm0, %v1019_v13, -inf  ;;  %v1038_v18 = vld [vmem:[%s1585_s0 + $0x40] sm:$0xff] }
   0x4   :  { %v78_v11 = vsel %vm62_vm0, %v1005_v9, -inf  ;;  %v81_v16 = vsel %vm62_vm0, %v1024_v14, -inf  ;;  %v1033_v17 = vld [vmem:[%s1585_s0 + $0x48] sm:$0xff]  ;;  %v87_v20 = vsel %vm62_vm0, %v1038_v18, -inf  ;;  %v1047_v21 = vld [vmem:[%s1585_s0 + $0x58] sm:$0xff]  ;;  %v1052_v22 = vld [vmem:[%s1585_s0 + $0x50] sm:$0xff] }
   0x5   :  { %v90_v19 = vsel %vm62_vm0, %v1033_v17, -inf }
   0x7   :  { %73 = vmax.xlane.f32.xlu1 %v72_v7  ;;  %67 = vmax.xlane.f32.xlu0 %v66_v8 }
   0xb   :  { %79 = vmax.xlane.f32.xlu1 %v78_v11  ;;  %76 = vmax.xlane.f32.xlu0 %v75_v12 }
   0xf   :  { %85 = vmax.xlane.f32.xlu1 %v84_v15  ;;  %82 = vmax.xlane.f32.xlu0 %v81_v16 }
  0x10   :  { %7 = vsyncpa [#allocation3], 0  ;;  %v96_v23 = vsel %vm62_vm0, %v1047_v21, -inf  ;;  %v93_v24 = vsel %vm62_vm0, %v1052_v22, -inf  ;;  %v1061_v25 = vld [vmem:[%s1585_s0 + $0x68] sm:$0xff]  ;;  %v1066_v26 = vld [vmem:[%s1585_s0 + $0x60] sm:$0xff] }
  0x11   :  { %v102_v27 = vsel %vm62_vm0, %v1061_v25, -inf  ;;  %v99_v28 = vsel %vm62_vm0, %v1066_v26, -inf  ;;  %v1075_v29 = vld [vmem:[%s1585_s0 + $0x78] sm:$0xff]  ;;  %v1080_v30 = vld [vmem:[%s1585_s0 + $0x70] sm:$0xff]  ;;  %v1089_v33 = vld [vmem:[%s1585_s0 + $0x88] sm:$0xff]  ;;  %s945_s25 = scalar_lea.hbm %s1587_s2, 16 }
  0x12   :  { %v108_v31 = vsel %vm62_vm0, %v1075_v29, -inf  ;;  %v105_v32 = vsel %vm62_vm0, %v1080_v30, -inf  ;;  %v1094_v34 = vld [vmem:[%s1585_s0 + $0x80] sm:$0xff]  ;;  %v114_v35 = vsel %vm62_vm0, %v1089_v33, -inf  ;;  %v1103_v37 = vld [vmem:[%s1585_s0 + $0x90] sm:$0xff]  ;;  %v1108_v38 = vld [vmem:[%s1585_s0 + $0x98] sm:$0xff]  ;;  %p946_p0 = scmp.ne.s32.totalorder %s1587_s2, %s945_s25  ;;  %p949_p1 = scmp.lt.u32.totalorder %s945_s25, %s1587_s2 }
  0x13   :  { %91 = vmax.xlane.f32.xlu1 %v90_v19  ;;  %88 = vmax.xlane.f32.xlu0 %v87_v20  ;;  %v111_v36 = vsel %vm62_vm0, %v1094_v34, -inf  ;;  %v117_v39 = vsel %vm62_vm0, %v1103_v37, -inf  ;;  %v120_v40 = vsel %vm62_vm0, %v1108_v38, -inf  ;;  %v1117_v41 = vld [vmem:[%s1585_s0 + $0xa0] sm:$0xff]  ;;  %v1122_v42 = vld [vmem:[%s1585_s0 + $0xa8] sm:$0xff]  ;;  %v1131_v45 = vld [vmem:[%s1585_s0 + $0xb0] sm:$0xff] }
  0x14   :  { %v123_v43 = vsel %vm62_vm0, %v1117_v41, -inf  ;;  %v126_v44 = vsel %vm62_vm0, %v1122_v42, -inf  ;;  %v1136_v46 = vld [vmem:[%s1585_s0 + $0xb8] sm:$0xff]  ;;  %v129_v47 = vsel %vm62_vm0, %v1131_v45, -inf  ;;  %v1145_v49 = vld [vmem:[%s1585_s0 + $0xc0] sm:$0xff]  ;;  %v38_v51 = vld [vmem:[%s1586_s1 + $0x8] sm:$0xff]  ;;  %p951_p2 = pnand %p949_p1, %p946_p0 }
  0x15   :  { %v132_v48 = vsel %vm62_vm0, %v1136_v46, -inf  ;;  %v135_v50 = vsel %vm62_vm0, %v1145_v49, -inf  ;;  %v37_v52 = vld [vmem:[%s1586_s1] sm:$0xff]  ;;  %v40_v53 = vld [vmem:[%s1586_s1 + $0x18] sm:$0xff]  ;;  %v39_v54 = vld [vmem:[%s1586_s1 + $0x10] sm:$0xff] }
  0x16   :  { %v42_v55 = vld [vmem:[%s1586_s1 + $0x28] sm:$0xff]  ;;  %v41_v56 = vld [vmem:[%s1586_s1 + $0x20] sm:$0xff]  ;;  %v44_v57 = vld [vmem:[%s1586_s1 + $0x38] sm:$0xff] }
  0x17   :  { %97 = vmax.xlane.f32.xlu1 %v96_v23  ;;  %94 = vmax.xlane.f32.xlu0 %v93_v24  ;;  %v43_v58 = vld [vmem:[%s1586_s1 + $0x30] sm:$0xff]  ;;  %v48_v59 = vld [vmem:[%s1586_s1 + $0x58] sm:$0xff]  ;;  %v45_v60 = vld [vmem:[%s1586_s1 + $0x40] sm:$0xff] }
  0x18   :  { %v53_v61 = vld [vmem:[%s1586_s1 + $0x80] sm:$0xff]  ;;  %v46_v62 = vld [vmem:[%s1586_s1 + $0x48] sm:$0xff]  ;;  %v55_v63 = vld [vmem:[%s1586_s1 + $0x90] sm:$0xff] }
  0x19   :  { %v47_v3 = vld [vmem:[%s1586_s1 + $0x50] sm:$0xff]  ;;  %v57_v4 = vld [vmem:[%s1586_s1 + $0xa0] sm:$0xff]  ;;  %v50_v8 = vld [vmem:[%s1586_s1 + $0x68] sm:$0xff] }
  0x1a   :  { %v49_v6 = vld [vmem:[%s1586_s1 + $0x60] sm:$0xff]  ;;  %v59_v7 = vld [vmem:[%s1586_s1 + $0xb0] sm:$0xff]  ;;  %v52_v15 = vld [vmem:[%s1586_s1 + $0x78] sm:$0xff] }
  0x1b   :  { %103 = vmax.xlane.f32.xlu1 %v102_v27  ;;  %100 = vmax.xlane.f32.xlu0 %v99_v28  ;;  %v61_v11 = vld [vmem:[%s1586_s1 + $0xc0] sm:$0xff]  ;;  %v51_v12 = vld [vmem:[%s1586_s1 + $0x70] sm:$0xff]  ;;  %v54_v16 = vld [vmem:[%s1586_s1 + $0x88] sm:$0xff] }
  0x1c   :  { %v56_v19 = vld [vmem:[%s1586_s1 + $0x98] sm:$0xff]  ;;  %v58_v20 = vld [vmem:[%s1586_s1 + $0xa8] sm:$0xff] }
  0x1d   :  { %v60_v23 = vld [vmem:[%s1586_s1 + $0xb8] sm:$0xff] }
  0x1f   :  { %109 = vmax.xlane.f32.xlu1 %v108_v31  ;;  %106 = vmax.xlane.f32.xlu0 %v105_v32 }
  0x23   :  { %115 = vmax.xlane.f32.xlu1 %v114_v35  ;;  %112 = vmax.xlane.f32.xlu0 %v111_v36 }
  0x27   :  { %118 = vmax.xlane.f32.xlu1 %v117_v39  ;;  %121 = vmax.xlane.f32.xlu0 %v120_v40 }
  0x2b   :  { %124 = vmax.xlane.f32.xlu1 %v123_v43  ;;  %127 = vmax.xlane.f32.xlu0 %v126_v44 }
  0x2f   :  { %130 = vmax.xlane.f32.xlu1 %v129_v47  ;;  %133 = vmax.xlane.f32.xlu0 %v132_v48 }
  0x33   :  { %136 = vmax.xlane.f32.xlu1 %v135_v50 }
  0x44   :  { %294 = vperm.xlu1 %794, %v38_v51  }
  0x45   :  { %291 = vperm.xlu0 %793, %v37_v52  }
  0x48   :  { %300 = vperm.xlu1 %794, %v40_v53  }
  0x49   :  { %297 = vperm.xlu0 %793, %v39_v54  }
  0x4c   :  { %306 = vperm.xlu1 %794, %v42_v55  }
  0x4d   :  { %303 = vperm.xlu0 %793, %v41_v56  }
  0x50   :  { %312 = vperm.xlu1 %794, %v44_v57  }
  0x51   :  { %309 = vperm.xlu0 %793, %v43_v58  }
  0x54   :  { %324 = vperm.xlu1 %794, %v48_v59  }
  0x55   :  { %315 = vperm.xlu0 %793, %v45_v60  }
  0x58   :  { %339 = vperm.xlu1 %794, %v53_v61  }
  0x59   :  { %318 = vperm.xlu0 %793, %v46_v62  }
  0x5c   :  { %345 = vperm.xlu1 %794, %v55_v63  }
  0x5d   :  { %321 = vperm.xlu0 %793, %v47_v3  }
  0x60   :  { %351 = vperm.xlu1 %794, %v57_v4  }
  0x61   :  { %327 = vperm.xlu0 %793, %v49_v6  }
  0x64   :  { %357 = vperm.xlu1 %794, %v59_v7  }
  0x65   :  { %330 = vperm.xlu0 %793, %v50_v8  }
  0x68   :  { %363 = vperm.xlu1 %794, %v61_v11  }
  0x69   :  { %333 = vperm.xlu0 %793, %v51_v12  }
  0x6d   :  { %336 = vperm.xlu0 %793, %v52_v15  }
  0x71   :  { %342 = vperm.xlu0 %793, %v54_v16  }
  0x75   :  { %348 = vperm.xlu0 %793, %v56_v19  }
  0x79   :  { %354 = vperm.xlu0 %793, %v58_v20  }
  0x7d   :  { %360 = vperm.xlu0 %793, %v60_v23  }
  0x90   :  { %v71_v24 = vpop.xlane.xlu1 %70  ;;  %v65_v27 = vpop.xlane.xlu0 %64 }
  0x91   :  { %v1225_v28 = vsub.f32 %v977_v0, %v71_v24  ;;  %v1228_v31 = vsub.f32 %v982_v1, %v65_v27 }
  0x93   :  { %v163_v32 = vmul.f32 1.442695, %v1228_v31  ;;  %v167_v35 = vmul.f32 1.442695, %v1225_v28 }
  0x94   :  { %v74_v36 = vpop.xlane.xlu1 %73  ;;  %v68_v39 = vpop.xlane.xlu0 %67 }
  0x95   :  { %v1233_v40 = vsub.f32 %v987_v2, %v74_v36  ;;  %v1236_v43 = vsub.f32 %v996_v5, %v68_v39  ;;  %795 = vpow2.f32 %v163_v32 }
  0x96   :  { %797 = vpow2.f32 %v167_v35 }
  0x97   :  { %v165_v44 = vmul.f32 1.442695, %v1236_v43  ;;  %v169_v0 = vmul.f32 1.442695, %v1233_v40 }
  0x98   :  { %v80_v1 = vpop.xlane.xlu1 %79  ;;  %v77_v47 = vpop.xlane.xlu0 %76 }
  0x99   :  { %v1241_v48 = vsub.f32 %v1005_v9, %v80_v1  ;;  %v1244_v50 = vsub.f32 %v1010_v10, %v77_v47  ;;  %799 = vpow2.f32 %v165_v44 }
  0x9a   :  { %801 = vpow2.f32 %v169_v0 }
  0x9b   :  { %v171_v2 = vmul.f32 1.442695, %v1244_v50  ;;  %v173_v5 = vmul.f32 1.442695, %v1241_v48 }
  0x9c   :  { %v86_v51 = vpop.xlane.xlu1 %85  ;;  %v83_v52 = vpop.xlane.xlu0 %82 }
  0x9d   :  { %v1249_v53 = vsub.f32 %v1019_v13, %v86_v51  ;;  %v1252_v54 = vsub.f32 %v1024_v14, %v83_v52  ;;  %803 = vpow2.f32 %v171_v2 }
  0x9e   :  { %805 = vpow2.f32 %v173_v5  ;;  %v288_v5 = vlaneseq }
  0x9f   :  { %v175_v9 = vmul.f32 1.442695, %v1252_v54  ;;  %v796_v55 = vpop.eup %795  ;;  %v177_v10 = vmul.f32 1.442695, %v1249_v53 }
  0xa0   :  { %v92_v56 = vpop.xlane.xlu1 %91  ;;  %v89_v57 = vpop.xlane.xlu0 %88  ;;  %v213_v58 = vsel %vm62_vm0, %v796_v55, 0.0  ;;  %v1298_v55 = vand.u32 127, %v288_v5 }
  0xa1   :  { %v798_v59 = vpop.eup %797  ;;  %807 = vpow2.f32 %v175_v9  ;;  %214 = vadd.xlane.f32.xlu0 %v213_v58  ;;  %v1275_v39 = vsub.f32 %v1038_v18, %v89_v57  ;;  %v1280_v0 = vsub.f32 %v1033_v17, %v92_v56 }
  0xa2   :  { %809 = vpow2.f32 %v177_v10  ;;  %v219_v14 = vsel %vm62_vm0, %v798_v59, 0.0 }
  0xa3   :  { %v800_v60 = vpop.eup %799  ;;  %v179_v1 = vmul.f32 1.442695, %v1275_v39  ;;  %v181_v51 = vmul.f32 1.442695, %v1280_v0 }
  0xa4   :  { %v98_v13 = vpop.xlane.xlu1 %97  ;;  %v95_v61 = vpop.xlane.xlu0 %94  ;;  %v216_v62 = vsel %vm62_vm0, %v800_v60, 0.0 }
  0xa5   :  { %v802_v63 = vpop.eup %801  ;;  %220 = vadd.xlane.f32.xlu0 %v219_v14  ;;  %217 = vadd.xlane.f32.xlu1 %v216_v62  ;;  %811 = vpow2.f32 %v179_v1  ;;  %v1289_v52 = vsub.f32 %v1052_v22, %v95_v61  ;;  %v1296_v17 = vsub.f32 %v1047_v21, %v98_v13 }
  0xa6   :  { %v222_v7 = vsel %vm62_vm0, %v802_v63, 0.0  ;;  %813 = vpow2.f32 %v181_v51 }
  0xa7   :  { %v804_v3 = vpop.eup %803  ;;  %v183_v10 = vmul.f32 1.442695, %v1289_v52  ;;  %v185_v58 = vmul.f32 1.442695, %v1296_v17 }
  0xa8   :  { %v104_v4 = vpop.xlane.xlu1 %103  ;;  %v101_v6 = vpop.xlane.xlu0 %100  ;;  %v225_v8 = vsel %vm62_vm0, %v804_v3, 0.0 }
  0xa9   :  { %v806_v11 = vpop.eup %805  ;;  %223 = vadd.xlane.f32.xlu0 %v222_v7  ;;  %226 = vadd.xlane.f32.xlu1 %v225_v8  ;;  %815 = vpow2.f32 %v183_v10  ;;  %v1305_v22 = vsub.f32 %v1066_v26, %v101_v6  ;;  %v1314_v26 = vsub.f32 %v1061_v25, %v104_v4 }
  0xaa   :  { %v228_v19 = vsel %vm62_vm0, %v806_v11, 0.0  ;;  %817 = vpow2.f32 %v185_v58 }
  0xab   :  { %v808_v12 = vpop.eup %807  ;;  %v189_v11 = vmul.f32 1.442695, %v1314_v26 }
  0xac   :  { %v1261_v15 = vpop.xlane.xlu1 %109  ;;  %v107_v16 = vpop.xlane.xlu0 %106  ;;  %v231_v20 = vsel %vm62_vm0, %v808_v12, 0.0 }
  0xad   :  { %v810_v23 = vpop.eup %809  ;;  %229 = vadd.xlane.f32.xlu0 %v228_v19  ;;  %232 = vadd.xlane.f32.xlu1 %v231_v20  ;;  %v1324_v25 = vsub.f32 %v1080_v30, %v107_v16 }
  0xae   :  { %v234_v32 = vsel %vm62_vm0, %v810_v23, 0.0 }
  0xaf   :  { %v812_v61 = vpop.eup %811  ;;  %v191_v30 = vmul.f32 1.442695, %v1324_v25 }
  0xb0   :  { %v1265_v24 = vpop.xlane.xlu1 %115  ;;  %v1267_v27 = vpop.xlane.xlu0 %112  ;;  %v237_v63 = vsel %vm62_vm0, %v812_v61, 0.0 }
  0xb1   :  { %235 = vadd.xlane.f32.xlu0 %v234_v32  ;;  %v814_v6 = vpop.eup %813 }
  0xb3   :  { %v816_v19 = vpop.eup %815 }
  0xb4   :  { %v1270_v35 = vpop.xlane.xlu1 %118  ;;  %v1272_v36 = vpop.xlane.xlu0 %121  ;;  %v243_v16 = vsel %vm62_vm0, %v816_v19, 0.0 }
  0xb5   :  { %v818_v1 = vpop.eup %817 }
  0xb6   :  { %v246_v10 = vsel %vm62_vm0, %v818_v1, 0.0 }
  0xb8   :  { %v1277_v44 = vpop.xlane.xlu1 %124  ;;  %v1283_v47 = vpop.xlane.xlu0 %127 }
  0xbc   :  { %v1285_v2 = vpop.xlane.xlu1 %130  ;;  %v1291_v18 = vpop.xlane.xlu0 %133 }
  0xbd   :  { %v1405_v1 = vsub.f32 %v1136_v46, %v1291_v18 }
  0xc0   :  { %v1293_v9 = vpop.xlane.xlu1 %136 }
  0xc4   :  { %v295_v56 = vpop.permute.xlu1 %294  ;;  %v292_v57 = vpop.permute.xlu0 %291 }
  0xc5   :  { %vm366_vm1 = vcmp.eq.s32.totalorder %v1298_v55, %v295_v56  ;;  %vm365_vm2 = vcmp.eq.s32.totalorder %v1298_v55, %v292_v57 }
  0xc6   :  { %v391_v21 = vsel %vm366_vm1, %v1236_v43, 0.0  ;;  %v390_v59 = vsel %vm365_vm2, %v1228_v31, 0.0  ;;  %v187_v43 = vmul.f32 1.442695, %v1305_v22 }
  0xc7   :  { %v418_v60 = vsel %vm62_vm0, %v391_v21, 0.0  ;;  %v415_v13 = vsel %vm62_vm0, %v390_v59, 0.0  ;;  %v1350_v21 = vsub.f32 %v1089_v33, %v1265_v24  ;;  %v1360_v33 = vsub.f32 %v1103_v37, %v1270_v35 }
  0xc8   :  { %v301_v14 = vpop.permute.xlu1 %300  ;;  %419 = vadd.xlane.f32.xlu0 %v418_v60  ;;  %416 = vadd.xlane.f32.xlu1 %v415_v13  ;;  %v298_v62 = vpop.permute.xlu0 %297  ;;  %819 = vpow2.f32 %v187_v43 }
  0xc9   :  { %vm368_vm3 = vcmp.eq.s32.totalorder %v1298_v55, %v301_v14  ;;  %vm367_vm4 = vcmp.eq.s32.totalorder %v1298_v55, %v298_v62  ;;  %821 = vpow2.f32 %v189_v11 }
  0xca   :  { %v392_v31 = vsel %vm367_vm4, %v1225_v28, 0.0  ;;  %v393_v8 = vsel %vm368_vm3, %v1233_v40, 0.0  ;;  %v240_v28 = vsel %vm62_vm0, %v814_v6, 0.0  ;;  %v1332_v40 = vsub.f32 %v1075_v29, %v1261_v15 }
  0xcb   :  { %v421_v3 = vsel %vm62_vm0, %v392_v31, 0.0  ;;  %v424_v12 = vsel %vm62_vm0, %v393_v8, 0.0  ;;  %823 = vpow2.f32 %v191_v30  ;;  %v1342_v29 = vsub.f32 %v1094_v34, %v1267_v27 }
  0xcc   :  { %238 = vadd.xlane.f32.xlu1 %v237_v63  ;;  %422 = vadd.xlane.f32.xlu0 %v421_v3  ;;  %v304_v7 = vpop.permute.xlu0 %303  ;;  %v307_v4 = vpop.permute.xlu1 %306  ;;  %v1369_v31 = vsub.f32 %v1108_v38, %v1272_v36 }
  0xcd   :  { %vm369_vm5 = vcmp.eq.s32.totalorder %v1298_v55, %v304_v7  ;;  %vm370_vm6 = vcmp.eq.s32.totalorder %v1298_v55, %v307_v4  ;;  %v195_v34 = vmul.f32 1.442695, %v1342_v29  ;;  %v1378_v7 = vsub.f32 %v1117_v41, %v1277_v44 }
  0xce   :  { %v394_v23 = vsel %vm369_vm5, %v1244_v50, 0.0  ;;  %v395_v51 = vsel %vm370_vm6, %v1241_v48, 0.0  ;;  %v193_v50 = vmul.f32 1.442695, %v1332_v40 }
  0xcf   :  { %v427_v32 = vsel %vm62_vm0, %v394_v23, 0.0  ;;  %v430_v56 = vsel %vm62_vm0, %v395_v51, 0.0  ;;  %v1396_v23 = vsub.f32 %v1131_v45, %v1285_v2 }
  0xd0   :  { %241 = vadd.xlane.f32.xlu1 %v240_v28  ;;  %425 = vadd.xlane.f32.xlu0 %v424_v12  ;;  %v310_v20 = vpop.permute.xlu0 %309  ;;  %v313_v15 = vpop.permute.xlu1 %312  ;;  %825 = vpow2.f32 %v193_v50  ;;  %v1387_v28 = vsub.f32 %v1122_v42, %v1283_v47  ;;  %v1414_v50 = vsub.f32 %v1145_v49, %v1293_v9 }
  0xd1   :  { %vm371_vm7 = vcmp.eq.s32.totalorder %v1298_v55, %v310_v20  ;;  %vm372_vm8 = vcmp.eq.s32.totalorder %v1298_v55, %v313_v15  ;;  %827 = vpow2.f32 %v195_v34 }
  0xd2   :  { %v820_v57 = vpop.eup %819  ;;  %v396_v48 = vsel %vm371_vm7, %v1252_v54, 0.0  ;;  %v397_v13 = vsel %vm372_vm8, %v1249_v53, 0.0  ;;  %v197_v54 = vmul.f32 1.442695, %v1350_v21  ;;  %v199_v53 = vmul.f32 1.442695, %v1360_v33 }
  0xd3   :  { %v249_v27 = vsel %vm62_vm0, %v820_v57, 0.0  ;;  %v433_v59 = vsel %vm62_vm0, %v396_v48, 0.0  ;;  %v822_v60 = vpop.eup %821  ;;  %v436_v14 = vsel %vm62_vm0, %v397_v13, 0.0  ;;  %v211_v57 = vmul.f32 1.442695, %v1414_v50 }
  0xd4   :  { %244 = vadd.xlane.f32.xlu1 %v243_v16  ;;  %428 = vadd.xlane.f32.xlu0 %v427_v32  ;;  %v316_v5 = vpop.permute.xlu0 %315  ;;  %v252_v61 = vsel %vm62_vm0, %v822_v60, 0.0  ;;  %829 = vpow2.f32 %v197_v54  ;;  %v325_v38 = vpop.permute.xlu1 %324 }
  0xd5   :  { %vm373_vm9 = vcmp.eq.s32.totalorder %v1298_v55, %v316_v5  ;;  %v824_v62 = vpop.eup %823  ;;  %831 = vpow2.f32 %v199_v53  ;;  %vm376_vm12 = vcmp.eq.s32.totalorder %v1298_v55, %v325_v38 }
  0xd6   :  { %v398_v43 = vsel %vm373_vm9, %v1275_v39, 0.0  ;;  %v255_v37 = vsel %vm62_vm0, %v824_v62, 0.0  ;;  %v201_v39 = vmul.f32 1.442695, %v1369_v31  ;;  %v401_v20 = vsel %vm376_vm12, %v1296_v17, 0.0 }
  0xd7   :  { %v439_v35 = vsel %vm62_vm0, %v398_v43, 0.0  ;;  %v448_v47 = vsel %vm62_vm0, %v401_v20, 0.0  ;;  %v207_v17 = vmul.f32 1.442695, %v1396_v23 }
  0xd8   :  { %247 = vadd.xlane.f32.xlu1 %v246_v10  ;;  %431 = vadd.xlane.f32.xlu0 %v430_v56  ;;  %v319_v58 = vpop.permute.xlu0 %318  ;;  %833 = vpow2.f32 %v201_v39  ;;  %v340_v46 = vpop.permute.xlu1 %339 }
  0xd9   :  { %vm374_vm10 = vcmp.eq.s32.totalorder %v1298_v55, %v319_v58  ;;  %vm381_vm2 = vcmp.eq.s32.totalorder %v1298_v55, %v340_v46 }
  0xda   :  { %v826_v63 = vpop.eup %825  ;;  %v399_v6 = vsel %vm374_vm10, %v1280_v0, 0.0  ;;  %v203_v0 = vmul.f32 1.442695, %v1378_v7  ;;  %v406_v13 = vsel %vm381_vm2, %v1342_v29, 0.0 }
  0xdb   :  { %v258_v36 = vsel %vm62_vm0, %v826_v63, 0.0  ;;  %v442_v8 = vsel %vm62_vm0, %v399_v6, 0.0  ;;  %v828_v11 = vpop.eup %827 }
  0xdc   :  { %250 = vadd.xlane.f32.xlu1 %v249_v27  ;;  %434 = vadd.xlane.f32.xlu0 %v433_v59  ;;  %v322_v24 = vpop.permute.xlu0 %321  ;;  %v261_v44 = vsel %vm62_vm0, %v828_v11, 0.0  ;;  %835 = vpow2.f32 %v203_v0  ;;  %v346_v48 = vpop.permute.xlu1 %345 }
  0xdd   :  { %vm375_vm11 = vcmp.eq.s32.totalorder %v1298_v55, %v322_v24  ;;  %vm383_vm4 = vcmp.eq.s32.totalorder %v1298_v55, %v346_v48 }
  0xde   :  { %v400_v4 = vsel %vm375_vm11, %v1289_v52, 0.0  ;;  %v830_v19 = vpop.eup %829  ;;  %v205_v52 = vmul.f32 1.442695, %v1387_v28 }
  0xdf   :  { %v445_v12 = vsel %vm62_vm0, %v400_v4, 0.0  ;;  %v264_v42 = vsel %vm62_vm0, %v830_v19, 0.0  ;;  %v832_v30 = vpop.eup %831 }
  0xe0   :  { %253 = vadd.xlane.f32.xlu1 %v252_v61  ;;  %437 = vadd.xlane.f32.xlu0 %v436_v14  ;;  %v328_v3 = vpop.permute.xlu0 %327  ;;  %837 = vpow2.f32 %v205_v52  ;;  %v267_v45 = vsel %vm62_vm0, %v832_v30, 0.0  ;;  %v352_v54 = vpop.permute.xlu1 %351 }
  0xe1   :  { %vm377_vm13 = vcmp.eq.s32.totalorder %v1298_v55, %v328_v3  ;;  %839 = vpow2.f32 %v207_v17  ;;  %vm385_vm5 = vcmp.eq.s32.totalorder %v1298_v55, %v352_v54 }
  0xe2   :  { %v402_v32 = vsel %vm377_vm13, %v1305_v22, 0.0  ;;  %v834_v5 = vpop.eup %833  ;;  %v209_v22 = vmul.f32 1.442695, %v1405_v1  ;;  %v410_v6 = vsel %vm385_vm5, %v1378_v7, 0.0 }
  0xe3   :  { %v451_v2 = vsel %vm62_vm0, %v402_v32, 0.0  ;;  %v270_v15 = vsel %vm62_vm0, %v834_v5, 0.0 }
  0xe4   :  { %256 = vadd.xlane.f32.xlu1 %v255_v37  ;;  %440 = vadd.xlane.f32.xlu0 %v439_v35  ;;  %v331_v41 = vpop.permute.xlu0 %330  ;;  %841 = vpow2.f32 %v209_v22  ;;  %v408_v37 = vsel %vm383_vm4, %v1360_v33, 0.0  ;;  %v358_v35 = vpop.permute.xlu1 %357 }
  0xe5   :  { %vm378_vm14 = vcmp.eq.s32.totalorder %v1298_v55, %v331_v41  ;;  %843 = vpow2.f32 %v211_v57  ;;  %vm387_vm7 = vcmp.eq.s32.totalorder %v1298_v55, %v358_v35 }
  0xe6   :  { %v403_v51 = vsel %vm378_vm14, %v1314_v26, 0.0  ;;  %v836_v56 = vpop.eup %835  ;;  %v412_v11 = vsel %vm387_vm7, %v1396_v23, 0.0 }
  0xe7   :  { %v454_v10 = vsel %vm62_vm0, %v403_v51, 0.0  ;;  %v273_v58 = vsel %vm62_vm0, %v836_v56, 0.0 }
  0xe8   :  { %259 = vadd.xlane.f32.xlu1 %v258_v36  ;;  %443 = vadd.xlane.f32.xlu0 %v442_v8  ;;  %v334_v16 = vpop.permute.xlu0 %333  ;;  %v364_v33 = vpop.permute.xlu1 %363  ;;  %v475_v36 = vsel %vm62_vm0, %v410_v6, 0.0 }
  0xe9   :  { %vm379_vm15 = vcmp.eq.s32.totalorder %v1298_v55, %v334_v16  ;;  %vm389_vm9 = vcmp.eq.s32.totalorder %v1298_v55, %v364_v33 }
  0xea   :  { %v404_v26 = vsel %vm379_vm15, %v1324_v25, 0.0  ;;  %v838_v9 = vpop.eup %837  ;;  %v414_v0 = vsel %vm389_vm9, %v1414_v50, 0.0 }
  0xeb   :  { %v457_v49 = vsel %vm62_vm0, %v404_v26, 0.0  ;;  %v276_v25 = vsel %vm62_vm0, %v838_v9, 0.0  ;;  %v840_v60 = vpop.eup %839 }
  0xec   :  { %262 = vadd.xlane.f32.xlu1 %v261_v44  ;;  %446 = vadd.xlane.f32.xlu0 %v445_v12  ;;  %v337_v18 = vpop.permute.xlu0 %336  ;;  %v279_v61 = vsel %vm62_vm0, %v840_v60, 0.0  ;;  %v487_v44 = vsel %vm62_vm0, %v414_v0, 0.0 }
  0xed   :  { %vm380_vm1 = vcmp.eq.s32.totalorder %v1298_v55, %v337_v18 }
  0xee   :  { %v405_v27 = vsel %vm380_vm1, %v1332_v40, 0.0  ;;  %v463_v40 = vsel %vm62_vm0, %v406_v13, 0.0  ;;  %v842_v14 = vpop.eup %841 }
  0xef   :  { %v460_v59 = vsel %vm62_vm0, %v405_v27, 0.0  ;;  %v282_v43 = vsel %vm62_vm0, %v842_v14, 0.0  ;;  %v844_v29 = vpop.eup %843 }
  0xf0   :  { %265 = vadd.xlane.f32.xlu1 %v264_v42  ;;  %449 = vadd.xlane.f32.xlu0 %v448_v47  ;;  %v343_v34 = vpop.permute.xlu0 %342  ;;  %v285_v3 = vsel %vm62_vm0, %v844_v29, 0.0 }
  0xf1   :  { %vm382_vm3 = vcmp.eq.s32.totalorder %v1298_v55, %v343_v34 }
  0xf2   :  { %v407_v62 = vsel %vm382_vm3, %v1350_v21, 0.0  ;;  %v469_v21 = vsel %vm62_vm0, %v408_v37, 0.0 }
  0xf3   :  { %v466_v53 = vsel %vm62_vm0, %v407_v62, 0.0 }
  0xf4   :  { %268 = vadd.xlane.f32.xlu1 %v267_v45  ;;  %452 = vadd.xlane.f32.xlu0 %v451_v2  ;;  %v349_v24 = vpop.permute.xlu0 %348 }
  0xf5   :  { %vm384_vm6 = vcmp.eq.s32.totalorder %v1298_v55, %v349_v24 }
  0xf6   :  { %v409_v39 = vsel %vm384_vm6, %v1369_v31, 0.0  ;;  %v481_v31 = vsel %vm62_vm0, %v412_v11, 0.0 }
  0xf7   :  { %v472_v8 = vsel %vm62_vm0, %v409_v39, 0.0 }
  0xf8   :  { %271 = vadd.xlane.f32.xlu1 %v270_v15  ;;  %455 = vadd.xlane.f32.xlu0 %v454_v10  ;;  %v355_v63 = vpop.permute.xlu0 %354 }
  0xf9   :  { %vm386_vm8 = vcmp.eq.s32.totalorder %v1298_v55, %v355_v63 }
  0xfa   :  { %v411_v7 = vsel %vm386_vm8, %v1387_v28, 0.0 }
  0xfb   :  { %v478_v4 = vsel %vm62_vm0, %v411_v7, 0.0 }
  0xfc   :  { %274 = vadd.xlane.f32.xlu1 %v273_v58  ;;  %458 = vadd.xlane.f32.xlu0 %v457_v49  ;;  %v361_v38 = vpop.permute.xlu0 %360 }
  0xfd   :  { %vm388_vm10 = vcmp.eq.s32.totalorder %v1298_v55, %v361_v38 }
  0xfe   :  { %v413_v41 = vsel %vm388_vm10, %v1405_v1, 0.0 }
  0xff   :  { %v484_v12 = vsel %vm62_vm0, %v413_v41, 0.0  ;;  %vm715_vm0 = vcmask 7168  }
 0x100   :  { %277 = vadd.xlane.f32.xlu1 %v276_v25  ;;  %461 = vadd.xlane.f32.xlu0 %v460_v59 }
 0x104   :  { %280 = vadd.xlane.f32.xlu1 %v279_v61  ;;  %464 = vadd.xlane.f32.xlu0 %v463_v40 }
 0x108   :  { %283 = vadd.xlane.f32.xlu1 %v282_v43  ;;  %467 = vadd.xlane.f32.xlu0 %v466_v53 }
 0x10c   :  { %286 = vadd.xlane.f32.xlu1 %v285_v3  ;;  %470 = vadd.xlane.f32.xlu0 %v469_v21 }
 0x110   :  { %476 = vadd.xlane.f32.xlu0 %v475_v36  ;;  %473 = vadd.xlane.f32.xlu1 %v472_v8 }
 0x114   :  { %482 = vadd.xlane.f32.xlu0 %v481_v31  ;;  %479 = vadd.xlane.f32.xlu1 %v478_v4 }
 0x118   :  { %488 = vadd.xlane.f32.xlu0 %v487_v44  ;;  %485 = vadd.xlane.f32.xlu1 %v484_v12 }
 0x12e   :  { %v215_v28 = vpop.xlane.xlu0 %214 }
 0x12f   :  { %845 = vlog2.f32 %v215_v28 }
 0x132   :  { %v221_v19 = vpop.xlane.xlu0 %220  ;;  %v218_v20 = vpop.xlane.xlu1 %217 }
 0x133   :  { %847 = vlog2.f32 %v218_v20 }
 0x134   :  { %849 = vlog2.f32 %v221_v19 }
 0x136   :  { %v224_v55 = vpop.xlane.xlu0 %223  ;;  %v227_v52 = vpop.xlane.xlu1 %226 }
 0x137   :  { %851 = vlog2.f32 %v224_v55 }
 0x138   :  { %853 = vlog2.f32 %v227_v52 }
 0x139   :  { %v846_v1 = vpop.eup %845 }
 0x13a   :  { %v230_v23 = vpop.xlane.xlu0 %229  ;;  %v233_v42 = vpop.xlane.xlu1 %232  ;;  %v491_v51 = vmul.f32 0.6931472, %v846_v1 }
 0x13b   :  { %855 = vlog2.f32 %v230_v23 }
 0x13c   :  { %857 = vlog2.f32 %v233_v42 }
 0x13d   :  { %v848_v5 = vpop.eup %847 }
 0x13e   :  { %v236_v47 = vpop.xlane.xlu0 %235  ;;  %v493_v18 = vmul.f32 0.6931472, %v848_v5  ;;  %v850_v15 = vpop.eup %849 }
 0x13f   :  { %859 = vlog2.f32 %v236_v47  ;;  %v495_v49 = vmul.f32 0.6931472, %v850_v15 }
 0x141   :  { %v852_v56 = vpop.eup %851 }
 0x142   :  { %v854_v9 = vpop.eup %853  ;;  %v497_v27 = vmul.f32 0.6931472, %v852_v56 }
 0x143   :  { %v499_v24 = vmul.f32 0.6931472, %v854_v9 }
 0x145   :  { %v856_v25 = vpop.eup %855 }
 0x146   :  { %v858_v61 = vpop.eup %857  ;;  %v501_v43 = vmul.f32 0.6931472, %v856_v25 }
 0x147   :  { %v503_v21 = vmul.f32 0.6931472, %v858_v61 }
 0x149   :  { %v860_v53 = vpop.eup %859 }
 0x14a   :  { %v505_v33 = vmul.f32 0.6931472, %v860_v53 }
 0x155   :  { %v417_v30 = vpop.xlane.xlu1 %416  ;;  %v420_v16 = vpop.xlane.xlu0 %419 }
 0x156   :  { %v1456_v46 = vsub.f32 %v491_v51, %v417_v30  ;;  %v1458_v10 = vsub.f32 %v493_v18, %v420_v16 }
 0x158   :  { %v565_v58 = vsub.f32 0.0, %v1456_v46  ;;  %v566_v48 = vsub.f32 0.0, %v1458_v10 }
 0x159   :  { %v239_v32 = vpop.xlane.xlu1 %238  ;;  %v423_v17 = vpop.xlane.xlu0 %422 }
 0x15a   :  { %861 = vlog2.f32 %v239_v32  ;;  %v1462_v34 = vsub.f32 %v495_v49, %v423_v17  ;;  %v590_v13 = vmul.f32 1.442695, %v565_v58  ;;  %v592_v40 = vmul.f32 1.442695, %v566_v48 }
 0x15c   :  { %v567_v14 = vsub.f32 0.0, %v1462_v34 }
 0x15d   :  { %v242_v45 = vpop.xlane.xlu1 %241  ;;  %v426_v2 = vpop.xlane.xlu0 %425 }
 0x15e   :  { %863 = vlog2.f32 %v242_v45  ;;  %v1464_v54 = vsub.f32 %v497_v27, %v426_v2  ;;  %v594_v6 = vmul.f32 1.442695, %v567_v14 }
 0x160   :  { %v568_v35 = vsub.f32 0.0, %v1464_v54 }
 0x161   :  { %v245_v22 = vpop.xlane.xlu1 %244  ;;  %v429_v50 = vpop.xlane.xlu0 %428 }
 0x162   :  { %865 = vlog2.f32 %v245_v22  ;;  %v1467_v62 = vsub.f32 %v499_v24, %v429_v50  ;;  %v596_v7 = vmul.f32 1.442695, %v568_v35 }
 0x163   :  { %867 = vpow2.f32 %v590_v13 }
 0x164   :  { %v862_v3 = vpop.eup %861  ;;  %v569_v39 = vsub.f32 0.0, %v1467_v62 }
 0x165   :  { %v248_v26 = vpop.xlane.xlu1 %247  ;;  %v432_v57 = vpop.xlane.xlu0 %431  ;;  %v507_v0 = vmul.f32 0.6931472, %v862_v3 }
 0x166   :  { %v1470_v63 = vsub.f32 %v501_v43, %v432_v57  ;;  %869 = vlog2.f32 %v248_v26  ;;  %v598_v41 = vmul.f32 1.442695, %v569_v39 }
 0x167   :  { %871 = vpow2.f32 %v592_v40 }
 0x168   :  { %v864_v38 = vpop.eup %863  ;;  %v570_v31 = vsub.f32 0.0, %v1470_v63 }
 0x169   :  { %v251_v59 = vpop.xlane.xlu1 %250  ;;  %v435_v60 = vpop.xlane.xlu0 %434  ;;  %v509_v12 = vmul.f32 0.6931472, %v864_v38 }
 0x16a   :  { %v1473_v36 = vsub.f32 %v503_v21, %v435_v60  ;;  %873 = vlog2.f32 %v251_v59  ;;  %v600_v52 = vmul.f32 1.442695, %v570_v31 }
 0x16b   :  { %875 = vpow2.f32 %v594_v6 }
 0x16c   :  { %v866_v28 = vpop.eup %865  ;;  %v571_v19 = vsub.f32 0.0, %v1473_v36  ;;  %877 = vpow2.f32 %v596_v7 }
 0x16d   :  { %v254_v29 = vpop.xlane.xlu1 %253  ;;  %v438_v37 = vpop.xlane.xlu0 %437  ;;  %v511_v16 = vmul.f32 0.6931472, %v866_v28 }
 0x16e   :  { %v1476_v4 = vsub.f32 %v505_v33, %v438_v37  ;;  %879 = vlog2.f32 %v254_v29  ;;  %v868_v47 = vpop.eup %867  ;;  %v602_v17 = vmul.f32 1.442695, %v571_v19 }
 0x16f   :  { %881 = vpow2.f32 %v598_v41  ;;  %v640_v50 = vsub.f32 1.0, %v868_v47 }
 0x170   :  { %v572_v23 = vsub.f32 0.0, %v1476_v4  ;;  %v870_v32 = vpop.eup %869  ;;  %883 = vpow2.f32 %v600_v52 }
 0x171   :  { %v257_v8 = vpop.xlane.xlu1 %256  ;;  %v441_v11 = vpop.xlane.xlu0 %440  ;;  %v513_v56 = vmul.f32 0.6931472, %v870_v32  ;;  %v665_v59 = vmul.f32 %v640_v50, %v640_v50 }
 0x172   :  { %v1478_v44 = vsub.f32 %v507_v0, %v441_v11  ;;  %v872_v2 = vpop.eup %871  ;;  %v604_v5 = vmul.f32 1.442695, %v572_v23  ;;  %885 = vlog2.f32 %v257_v8 }
 0x173   :  { %v641_v57 = vsub.f32 1.0, %v872_v2  ;;  %887 = vpow2.f32 %v602_v17  ;;  %v690_v21 = vmul.f32 %v665_v59, %v1456_v46 }
 0x174   :  { %v573_v30 = vsub.f32 0.0, %v1478_v44  ;;  %v874_v26 = vpop.eup %873  ;;  %889 = vpow2.f32 %v604_v5 }
 0x175   :  { %v260_v20 = vpop.xlane.xlu1 %259  ;;  %v444_v55 = vpop.xlane.xlu0 %443  ;;  %v515_v13 = vmul.f32 0.6931472, %v874_v26  ;;  %v666_v61 = vmul.f32 %v641_v57, %v641_v57 }
 0x176   :  { %v1482_v42 = vsub.f32 %v509_v12, %v444_v55  ;;  %v606_v18 = vmul.f32 1.442695, %v573_v30  ;;  %v876_v9 = vpop.eup %875  ;;  %891 = vlog2.f32 %v260_v20  ;;  %v716_v55 = vsel %vm715_vm0, %v690_v21, 0.0 }
 0x177   :  { %v878_v25 = vpop.eup %877  ;;  %v642_v40 = vsub.f32 1.0, %v876_v9  ;;  %v691_v38 = vmul.f32 %v666_v61, %v1458_v10 }
 0x178   :  { %v574_v51 = vsub.f32 0.0, %v1482_v42  ;;  %893 = vpow2.f32 %v606_v18  ;;  %v880_v24 = vpop.eup %879  ;;  %v643_v35 = vsub.f32 1.0, %v878_v25 }
 0x179   :  { %v263_v1 = vpop.xlane.xlu1 %262  ;;  %v447_v45 = vpop.xlane.xlu0 %446  ;;  %v517_v39 = vmul.f32 0.6931472, %v880_v24  ;;  %v667_v8 = vmul.f32 %v642_v40, %v642_v40  ;;  %v717_v10 = vsel %vm715_vm0, %v691_v38, 0.0 }
 0x17a   :  { %v1486_v22 = vsub.f32 %v511_v16, %v447_v45  ;;  %v608_v48 = vmul.f32 1.442695, %v574_v51  ;;  %v882_v29 = vpop.eup %881  ;;  %v668_v19 = vmul.f32 %v643_v35, %v643_v35 }
 0x17b   :  { %v884_v3 = vpop.eup %883  ;;  %v644_v11 = vsub.f32 1.0, %v882_v29  ;;  %v692_v30 = vmul.f32 %v667_v8, %v1462_v34 }
 0x17c   :  { %v575_v15 = vsub.f32 0.0, %v1486_v22  ;;  %895 = vpow2.f32 %v608_v48  ;;  %v886_v33 = vpop.eup %885  ;;  %v645_v20 = vsub.f32 1.0, %v884_v3  ;;  %v693_v51 = vmul.f32 %v668_v19, %v1464_v54 }
 0x17d   :  { %v266_v58 = vpop.xlane.xlu1 %265  ;;  %v450_v49 = vpop.xlane.xlu0 %449  ;;  %897 = vlog2.f32 %v263_v1  ;;  %v519_v23 = vmul.f32 0.6931472, %v886_v33  ;;  %v669_v16 = vmul.f32 %v644_v11, %v644_v11 }
 0x17e   :  { %v1489_v27 = vsub.f32 %v513_v56, %v450_v49  ;;  %v610_v60 = vmul.f32 1.442695, %v575_v15  ;;  %v888_v28 = vpop.eup %887  ;;  %v670_v50 = vmul.f32 %v645_v20, %v645_v20  ;;  %v718_v15 = vadd.f32 %v717_v10, %v716_v55 }
 0x17f   :  { %v890_v46 = vpop.eup %889  ;;  %v646_v45 = vsub.f32 1.0, %v888_v28  ;;  %v694_v49 = vmul.f32 %v669_v16, %v1467_v62  ;;  %v721_v24 = vsel %vm715_vm0, %v693_v51, 0.0 }
 0x180   :  { %v576_v14 = vsub.f32 0.0, %v1489_v27  ;;  %899 = vpow2.f32 %v610_v60  ;;  %v892_v47 = vpop.eup %891  ;;  %v647_v56 = vsub.f32 1.0, %v890_v46  ;;  %v695_v61 = vmul.f32 %v670_v50, %v1470_v63 }
 0x181   :  { %v269_v43 = vpop.xlane.xlu1 %268  ;;  %v453_v53 = vpop.xlane.xlu0 %452  ;;  %901 = vlog2.f32 %v266_v58  ;;  %v521_v34 = vmul.f32 0.6931472, %v892_v47  ;;  %v719_v58 = vsel %vm715_vm0, %v692_v30, 0.0  ;;  %v671_v60 = vmul.f32 %v646_v45, %v646_v45 }
 0x182   :  { %v1492_v37 = vsub.f32 %v515_v13, %v453_v53  ;;  %v612_v7 = vmul.f32 1.442695, %v576_v14  ;;  %v894_v1 = vpop.eup %893  ;;  %v672_v14 = vmul.f32 %v647_v56, %v647_v56  ;;  %v720_v29 = vadd.f32 %v719_v58, %v718_v15 }
 0x183   :  { %v648_v9 = vsub.f32 1.0, %v894_v1  ;;  %v723_v35 = vsel %vm715_vm0, %v694_v49, 0.0  ;;  %v696_v33 = vmul.f32 %v671_v60, %v1473_v36 }
 0x184   :  { %v577_v6 = vsub.f32 0.0, %v1492_v37  ;;  %903 = vpow2.f32 %v612_v7  ;;  %v722_v11 = vadd.f32 %v721_v24, %v720_v29  ;;  %v725_v7 = vsel %vm715_vm0, %v695_v61, 0.0 }
 0x185   :  { %v272_v31 = vpop.xlane.xlu1 %271  ;;  %v456_v0 = vpop.xlane.xlu0 %455  ;;  %v673_v3 = vmul.f32 %v648_v9, %v648_v9  ;;  %v727_v47 = vsel %vm715_vm0, %v696_v33, 0.0 }
 0x186   :  { %v614_v41 = vmul.f32 1.442695, %v577_v6  ;;  %v1497_v12 = vsub.f32 %v517_v39, %v456_v0  ;;  %v896_v18 = vpop.eup %895  ;;  %v724_v46 = vadd.f32 %v723_v35, %v722_v11 }
 0x187   :  { %v898_v57 = vpop.eup %897  ;;  %v649_v40 = vsub.f32 1.0, %v896_v18  ;;  %v698_v36 = vmul.f32 %v673_v3, %v1478_v44 }
 0x188   :  { %v578_v52 = vsub.f32 0.0, %v1497_v12  ;;  %905 = vpow2.f32 %v614_v41  ;;  %v697_v41 = vmul.f32 %v672_v14, %v1476_v4 }
 0x189   :  { %v275_v32 = vpop.xlane.xlu1 %274  ;;  %v459_v17 = vpop.xlane.xlu0 %458  ;;  %907 = vlog2.f32 %v269_v43  ;;  %v523_v43 = vmul.f32 0.6931472, %v898_v57  ;;  %v731_v15 = vsel %vm715_vm0, %v698_v36, 0.0 }
 0x18a   :  { %v616_v2 = vmul.f32 1.442695, %v578_v52  ;;  %v1503_v5 = vsub.f32 %v519_v23, %v459_v17  ;;  %909 = vlog2.f32 %v272_v31  ;;  %v900_v59 = vpop.eup %899  ;;  %v674_v31 = vmul.f32 %v649_v40, %v649_v40 }
 0x18b   :  { %v902_v53 = vpop.eup %901  ;;  %v650_v21 = vsub.f32 1.0, %v900_v59  ;;  %v726_v17 = vadd.f32 %v725_v7, %v724_v46 }
 0x18c   :  { %v579_v26 = vsub.f32 0.0, %v1503_v5  ;;  %911 = vpow2.f32 %v616_v2  ;;  %v525_v19 = vmul.f32 0.6931472, %v902_v53  ;;  %v699_v4 = vmul.f32 %v674_v31, %v1482_v42 }
 0x18d   :  { %v278_v48 = vpop.xlane.xlu1 %277  ;;  %v462_v25 = vpop.xlane.xlu0 %461  ;;  %913 = vlog2.f32 %v275_v32  ;;  %v675_v55 = vmul.f32 %v650_v21, %v650_v21  ;;  %v729_v2 = vsel %vm715_vm0, %v697_v41, 0.0  ;;  %v728_v18 = vadd.f32 %v727_v47, %v726_v17 }
 0x18e   :  { %v618_v54 = vmul.f32 1.442695, %v579_v26  ;;  %v1509_v13 = vsub.f32 %v521_v34, %v462_v25  ;;  %v904_v8 = vpop.eup %903 }
 0x18f   :  { %v651_v10 = vsub.f32 1.0, %v904_v8  ;;  %v700_v56 = vmul.f32 %v675_v55, %v1486_v22  ;;  %v730_v9 = vadd.f32 %v729_v2, %v728_v18 }
 0x190   :  { %915 = vpow2.f32 %v618_v54  ;;  %v580_v62 = vsub.f32 0.0, %v1509_v13 }
 0x191   :  { %v281_v6 = vpop.xlane.xlu1 %280  ;;  %v465_v39 = vpop.xlane.xlu0 %464  ;;  %917 = vlog2.f32 %v278_v48  ;;  %v676_v58 = vmul.f32 %v651_v10, %v651_v10  ;;  %v733_v48 = vsel %vm715_vm0, %v699_v4, 0.0  ;;  %v732_v40 = vadd.f32 %v731_v15, %v730_v9 }
 0x192   :  { %v620_v38 = vmul.f32 1.442695, %v580_v62  ;;  %v1516_v63 = vsub.f32 %v523_v43, %v465_v39  ;;  %919 = vlog2.f32 %v281_v6  ;;  %v906_v0 = vpop.eup %905  ;;  %v735_v14 = vsel %vm715_vm0, %v700_v56, 0.0 }
 0x193   :  { %v908_v20 = vpop.eup %907  ;;  %v652_v1 = vsub.f32 1.0, %v906_v0  ;;  %v701_v35 = vmul.f32 %v676_v58, %v1489_v27  ;;  %v734_v39 = vadd.f32 %v733_v48, %v732_v40 }
 0x194   :  { %921 = vpow2.f32 %v620_v38  ;;  %v581_v28 = vsub.f32 0.0, %v1516_v63  ;;  %v910_v32 = vpop.eup %909  ;;  %v527_v51 = vmul.f32 0.6931472, %v908_v20 }
 0x195   :  { %v284_v52 = vpop.xlane.xlu1 %283  ;;  %v468_v23 = vpop.xlane.xlu0 %467  ;;  %v677_v25 = vmul.f32 %v652_v1, %v652_v1  ;;  %v529_v24 = vmul.f32 0.6931472, %v910_v32  ;;  %v736_v41 = vadd.f32 %v735_v14, %v734_v39  ;;  %v737_v36 = vsel %vm715_vm0, %v701_v35, 0.0 }
 0x196   :  { %v622_v30 = vmul.f32 1.442695, %v581_v28  ;;  %v1523_v16 = vsub.f32 %v525_v19, %v468_v23  ;;  %923 = vlog2.f32 %v284_v52  ;;  %v912_v45 = vpop.eup %911 }
 0x197   :  { %v914_v50 = vpop.eup %913  ;;  %v653_v59 = vsub.f32 1.0, %v912_v45  ;;  %v702_v33 = vmul.f32 %v677_v25, %v1492_v37  ;;  %v738_v18 = vadd.f32 %v737_v36, %v736_v41 }
 0x198   :  { %925 = vpow2.f32 %v622_v30  ;;  %v582_v44 = vsub.f32 0.0, %v1523_v16  ;;  %v531_v61 = vmul.f32 0.6931472, %v914_v50 }
 0x199   :  { %v287_v26 = vpop.xlane.xlu1 %286  ;;  %v471_v34 = vpop.xlane.xlu0 %470  ;;  %v678_v38 = vmul.f32 %v653_v59, %v653_v59  ;;  %v739_v17 = vsel %vm715_vm0, %v702_v33, 0.0 }
 0x19a   :  { %v916_v57 = vpop.eup %915  ;;  %v624_v42 = vmul.f32 1.442695, %v582_v44  ;;  %927 = vlog2.f32 %v287_v26  ;;  %v1530_v49 = vsub.f32 %v527_v51, %v471_v34  ;;  %v740_v9 = vadd.f32 %v739_v17, %v738_v18 }
 0x19b   :  { %v918_v60 = vpop.eup %917  ;;  %v654_v62 = vsub.f32 1.0, %v916_v57  ;;  %v703_v23 = vmul.f32 %v678_v38, %v1497_v12 }
 0x19c   :  { %929 = vpow2.f32 %v624_v42  ;;  %v583_v54 = vsub.f32 0.0, %v1530_v49  ;;  %v920_v22 = vpop.eup %919  ;;  %v533_v31 = vmul.f32 0.6931472, %v918_v60 }
 0x19d   :  { %v474_v43 = vpop.xlane.xlu1 %473  ;;  %v477_v53 = vpop.xlane.xlu0 %476  ;;  %v679_v28 = vmul.f32 %v654_v62, %v654_v62  ;;  %v535_v19 = vmul.f32 0.6931472, %v920_v22  ;;  %v741_v34 = vsel %vm715_vm0, %v703_v23, 0.0 }
 0x19e   :  { %v922_v29 = vpop.eup %921  ;;  %v626_v3 = vmul.f32 1.442695, %v583_v54  ;;  %v1536_v21 = vsub.f32 %v529_v24, %v474_v43  ;;  %v1538_v6 = vsub.f32 %v531_v61, %v477_v53  ;;  %v742_v24 = vadd.f32 %v741_v34, %v740_v9 }
 0x19f   :  { %v655_v8 = vsub.f32 1.0, %v922_v29  ;;  %v704_v45 = vmul.f32 %v679_v28, %v1503_v5 }
 0x1a0   :  { %931 = vpow2.f32 %v626_v3  ;;  %v584_v11 = vsub.f32 0.0, %v1536_v21  ;;  %v585_v7 = vsub.f32 0.0, %v1538_v6  ;;  %v924_v0 = vpop.eup %923 }
 0x1a1   :  { %v480_v27 = vpop.xlane.xlu1 %479  ;;  %v483_v20 = vpop.xlane.xlu0 %482  ;;  %v680_v47 = vmul.f32 %v655_v8, %v655_v8  ;;  %v537_v1 = vmul.f32 0.6931472, %v924_v0  ;;  %v743_v25 = vsel %vm715_vm0, %v704_v45, 0.0 }
 0x1a2   :  { %v926_v46 = vpop.eup %925  ;;  %v628_v55 = vmul.f32 1.442695, %v584_v11  ;;  %v630_v52 = vmul.f32 1.442695, %v585_v7  ;;  %v1544_v37 = vsub.f32 %v533_v31, %v480_v27  ;;  %v1547_v30 = vsub.f32 %v535_v19, %v483_v20 }
 0x1a3   :  { %v656_v10 = vsub.f32 1.0, %v926_v46  ;;  %v705_v57 = vmul.f32 %v680_v47, %v1509_v13  ;;  %v744_v62 = vadd.f32 %v743_v25, %v742_v24 }
 0x1a4   :  { %v928_v32 = vpop.eup %927  ;;  %933 = vpow2.f32 %v628_v55  ;;  %v586_v4 = vsub.f32 0.0, %v1544_v37  ;;  %v587_v44 = vsub.f32 0.0, %v1547_v30 }
 0x1a5   :  { %v681_v2 = vmul.f32 %v656_v10, %v656_v10  ;;  %935 = vpow2.f32 %v630_v52  ;;  %v486_v51 = vpop.xlane.xlu1 %485  ;;  %v489_v50 = vpop.xlane.xlu0 %488  ;;  %v539_v26 = vmul.f32 0.6931472, %v928_v32  ;;  %v745_v40 = vsel %vm715_vm0, %v705_v57, 0.0 }
 0x1a6   :  { %v930_v12 = vpop.eup %929  ;;  %v632_v15 = vmul.f32 1.442695, %v586_v4  ;;  %v563_v56 = vsub.f32 %v537_v1, %v486_v51  ;;  %v634_v42 = vmul.f32 1.442695, %v587_v44  ;;  %v746_v3 = vadd.f32 %v745_v40, %v744_v62 }
 0x1a7   :  { %v657_v58 = vsub.f32 1.0, %v930_v12  ;;  %v564_v48 = vsub.f32 %v539_v26, %v489_v50  ;;  %v706_v59 = vmul.f32 %v681_v2, %v1516_v63 }
 0x1a8   :  { %937 = vpow2.f32 %v632_v15  ;;  %v588_v5 = vsub.f32 0.0, %v563_v56 }
 0x1a9   :  { %v682_v60 = vmul.f32 %v657_v58, %v657_v58  ;;  %939 = vpow2.f32 %v634_v42  ;;  %v589_v22 = vsub.f32 0.0, %v564_v48  ;;  %v747_v53 = vsel %vm715_vm0, %v706_v59, 0.0 }
 0x1aa   :  { %v932_v54 = vpop.eup %931  ;;  %v636_v61 = vmul.f32 1.442695, %v588_v5  ;;  %v748_v8 = vadd.f32 %v747_v53, %v746_v3 }
 0x1ab   :  { %v707_v13 = vmul.f32 %v682_v60, %v1523_v16  ;;  %v658_v14 = vsub.f32 1.0, %v932_v54  ;;  %v638_v43 = vmul.f32 1.442695, %v589_v22 }
 0x1ac   :  { %941 = vpow2.f32 %v636_v61 }
 0x1ad   :  { %v683_v29 = vmul.f32 %v658_v14, %v658_v14  ;;  %943 = vpow2.f32 %v638_v43  ;;  %v749_v39 = vsel %vm715_vm0, %v707_v13, 0.0 }
 0x1ae   :  { %v934_v35 = vpop.eup %933  ;;  %v750_v0 = vadd.f32 %v749_v39, %v748_v8 }
 0x1af   :  { %v936_v63 = vpop.eup %935  ;;  %v708_v33 = vmul.f32 %v683_v29, %v1530_v49  ;;  %v659_v38 = vsub.f32 1.0, %v934_v35 }
 0x1b0   :  { %v660_v11 = vsub.f32 1.0, %v936_v63 }
 0x1b1   :  { %v751_v16 = vsel %vm715_vm0, %v708_v33, 0.0  ;;  %v684_v7 = vmul.f32 %v659_v38, %v659_v38 }
 0x1b2   :  { %v938_v31 = vpop.eup %937  ;;  %v685_v41 = vmul.f32 %v660_v11, %v660_v11  ;;  %v752_v20 = vadd.f32 %v751_v16, %v750_v0 }
 0x1b3   :  { %v940_v28 = vpop.eup %939  ;;  %v709_v27 = vmul.f32 %v684_v7, %v1536_v21  ;;  %v661_v19 = vsub.f32 1.0, %v938_v31 }
 0x1b4   :  { %v710_v46 = vmul.f32 %v685_v41, %v1538_v6  ;;  %v662_v36 = vsub.f32 1.0, %v940_v28 }
 0x1b5   :  { %v753_v55 = vsel %vm715_vm0, %v709_v27, 0.0  ;;  %v686_v49 = vmul.f32 %v661_v19, %v661_v19 }
 0x1b6   :  { %v942_v52 = vpop.eup %941  ;;  %v754_v23 = vadd.f32 %v753_v55, %v752_v20  ;;  %v687_v47 = vmul.f32 %v662_v36, %v662_v36  ;;  %v755_v10 = vsel %vm715_vm0, %v710_v46, 0.0 }
 0x1b7   :  { %v711_v32 = vmul.f32 %v686_v49, %v1544_v37  ;;  %v663_v17 = vsub.f32 1.0, %v942_v52  ;;  %v944_v4 = vpop.eup %943 }
 0x1b8   :  { %v756_v1 = vadd.f32 %v755_v10, %v754_v23  ;;  %v712_v21 = vmul.f32 %v687_v47, %v1547_v30  ;;  %v664_v6 = vsub.f32 1.0, %v944_v4 }
 0x1b9   :  { %v757_v45 = vsel %vm715_vm0, %v711_v32, 0.0  ;;  %v688_v2 = vmul.f32 %v663_v17, %v663_v17 }
 0x1ba   :  { %v758_v44 = vadd.f32 %v757_v45, %v756_v1  ;;  %v759_v51 = vsel %vm715_vm0, %v712_v21, 0.0  ;;  %v689_v12 = vmul.f32 %v664_v6, %v664_v6 }
 0x1bb   :  { %v713_v50 = vmul.f32 %v688_v2, %v563_v56 }
 0x1bc   :  { %v760_v18 = vadd.f32 %v759_v51, %v758_v44  ;;  %v714_v15 = vmul.f32 %v689_v12, %v564_v48 }
 0x1bd   :  { %v761_v26 = vsel %vm715_vm0, %v713_v50, 0.0 }
 0x1be   :  { %v762_v34 = vadd.f32 %v761_v26, %v760_v18  ;;  %v763_v37 = vsel %vm715_vm0, %v714_v15, 0.0 }
 0x1c0   :  { %v764_v57 = vadd.f32 %v763_v37, %v762_v34 }
 0x1c2   :  { %765 = vadd.xlane.f32.xlu1 %v764_v57 }
 0x24f   :  { %v766_v58 = vpop.xlane.xlu1 %765 }
 0x250   :  { %v767_v30 = vrot.slane %v766_v58, 4 }
 0x252   :  { %v768_v42 = vadd.f32 %v767_v30, %v766_v58 }
 0x254   :  { %v769_v9 = vrot.slane %v768_v42, 2 }
 0x256   :  { %v770_v5 = vadd.f32 %v769_v9, %v768_v42 }
 0x258   :  { %v771_v25 = vrot.slane %v770_v5, 1 }
 0x25a   :  { %v772_v59 = vadd.f32 %v771_v25, %v770_v5 }
 0x25c   :  { %789 = vpush %v772_v59 }
 0x28d   :  { %s790_s1 = spop %789 }
 0x28e   :  { %775 = sst [smem:[#allocation2]] %s790_s1 }
 0x28f   :  { %954 = shalt.err (!%p951_p2)
}
 0x290   :  { %s958_s30 = smov [#allocation2]  }
 0x291   :  { %783 = dma.smem_to_hbm %s958_s30, 16, %s1587_s2, [#allocation3]  }
 0x292   :  { %955 = dma.done.wait [#allocation3], 16  }
 0x293   :  { %956 = vsyncadd [#allocation3], 4294967280 }
 0x294   :  { %787 = sfence }
 0x295   :  { %788 = vsyncpa [#allocation3], 1 }

</bundles_post_ra>
